<compile_context>
chip_gen: v5e
topology: v5e:2x2
jax: 0.10.0
libtpu: 0.0.40
codegen_flags: <defaults>
</compile_context>

<pallas_src>
import jax
import jax.numpy as jnp
import numpy as np
from jax.experimental import pallas as pl
from jax.experimental.pallas import tpu as pltpu


def mlp_kernel(x_ref, w1_ref, b1_ref, w2_ref, b2_ref, w3t_ref, b3t_ref, ot_ref):
    x = x_ref[...]                                                    # [TB, in_dim]
    # fc1 + ReLU
    h1 = jnp.dot(x, w1_ref[...], preferred_element_type=jnp.float32) + b1_ref[...]
    h1 = jnp.maximum(h1, 0.0)                                         # [TB, 64]
    # fc2 + ReLU
    h2 = jnp.dot(h1, w2_ref[...], preferred_element_type=jnp.float32) + b2_ref[...]
    h2 = jnp.maximum(h2, 0.0)                                         # [TB, 32]
    # fc3, emitted transposed: [out_pad8, TB] = w3t[out_pad8, 32] . h2^T[32, TB]
    # (batch on the lane axis -> lane-dense stores, ~16x less HBM writeback
    #  than padding out_dim to 128 lanes).
    out_t = jnp.einsum("ok,bk->ob", w3t_ref[...], h2,
                       preferred_element_type=jnp.float32)
    ot_ref[...] = (out_t + b3t_ref[...]).astype(ot_ref.dtype)


def _round_up(x, m):
    return ((x + m - 1) // m) * m


def _cdiv(a, b):
    return -(-a // b)


def net_forward(x, params, *, tb=2048, min_pallas_batch=0):
    """Forward pass of Net.  x: [B, input_dim] float32.

    Weights w1/w2/w3 are stored as [in_features, out_features] (transposed
    from PyTorch's [out, in]); biases as [1, out_features].
    `tb` caps the batch tile; `min_pallas_batch` (e.g. 512) routes small
    batches to a fused-XLA fast path instead of a kernel launch.
    """
    w1, b1, w2, b2, w3, b3 = (
        params["w1"], params["b1"],
        params["w2"], params["b2"],
        params["w3"], params["b3"],
    )
    B, in_dim = x.shape
    out_dim = w3.shape[1]

    # ---- small-batch fast path: tiny MLP fuses well in plain XLA ----
    if B < min_pallas_batch:
        return net_reference(x, params)

    # ---- transposed / padded fc3 parameters (PyTorch [out, in] layout) ----
    out_pad8 = _round_up(out_dim, 8)                 # sublane-align output rows
    w3t = jnp.pad(w3.T, ((0, out_pad8 - out_dim), (0, 0)))   # [out_pad8, 32]
    b3t = jnp.pad(b3.T, ((0, out_pad8 - out_dim), (0, 0)))   # [out_pad8, 1]

    # ---- batch tiling ----
    SINGLE_TILE_MAX = 512
    tb_cap = max(128, _round_up(min(int(tb), 4096), 128))
    if B <= min(SINGLE_TILE_MAX, tb_cap):
        # Single tile: block shape == full array, so no 128-multiple needed.
        TB = _round_up(max(B, 1), 8)
        Bp = TB
    else:
        # Multi-tile: TB multiple of 128 (lane-dense transposed output stores),
        # and at least 2 tiles so the "parallel" grid axis shards across the
        # two TensorCores on v7x.
        n_tiles = max(2, _cdiv(B, tb_cap))
        TB = _round_up(_cdiv(B, n_tiles), 128)
        Bp = TB * n_tiles
    grid = (Bp // TB,)

    if Bp != B:
        x = jnp.pad(x, ((0, Bp - B), (0, 0)))

    # x blocks move with the grid; weights/biases resident (constant index_map);
    # output is the transposed [out_pad8, Bp] slab, tiled along the lane axis.
    x_spec = pl.BlockSpec((TB, in_dim), lambda i: (i, 0))
    out_spec = pl.BlockSpec((out_pad8, TB), lambda i: (0, i))
    const = lambda shape: pl.BlockSpec(shape, lambda i: (0, 0))

    weight_bytes = 4 * (in_dim * 64 + 64 + 64 * 32 + 32 + out_pad8 * 32 + out_pad8)
    cost = pl.CostEstimate(
        flops=2 * Bp * (in_dim * 64 + 64 * 32 + 32 * out_pad8),
        transcendentals=0,
        bytes_accessed=4 * Bp * (in_dim + out_pad8) + weight_bytes,
    )

    # VMEM budget from the actual footprint (double-buffered x / out blocks,
    # weights, h1/h2 staging) with ~2x headroom; capped so it is safe on
    # v7x's 64 MiB physical VMEM as well as v5e/v6e.
    footprint = (
        2 * TB * in_dim * 4        # x, double-buffered
        + 2 * out_pad8 * TB * 4    # transposed output, double-buffered
        + 2 * weight_bytes         # resident weights/biases (conservative 2x)
        + 2 * TB * (64 + 32) * 4   # h1/h2 VMEM staging
    )
    vmem_limit = int(min(max(2 * footprint, 8 << 20), 48 << 20))

    out_t = pl.pallas_call(
        mlp_kernel,
        out_shape=jax.ShapeDtypeStruct((out_pad8, Bp), jnp.float32),
        grid=grid,
        in_specs=[
            x_spec,
            const(w1.shape), const(b1.shape),
            const(w2.shape), const(b2.shape),
            const(w3t.shape), const(b3t.shape),
        ],
        out_specs=out_spec,
        compiler_params=pltpu.CompilerParams(
            dimension_semantics=("parallel",),
            vmem_limit_bytes=vmem_limit,
        ),
        cost_estimate=cost,
    )(x, w1, b1, w2, b2, w3t, b3t)

    # Slice off padded output rows / batch rows and transpose back (tiny).
    return out_t[:out_dim, :B].T


def init_params(key, input_dim, output_dim):
    """Deterministic init mirroring PyTorch Linear's U(-1/sqrt(fan_in), +1/sqrt(fan_in))."""
    dims = [(input_dim, 64), (64, 32), (32, output_dim)]
    params = {}
    for i, (fan_in, fan_out) in enumerate(dims, start=1):
        key, kw, kb = jax.random.split(key, 3)
        bound = 1.0 / np.sqrt(fan_in)
        params[f"w{i}"] = jax.random.uniform(
            kw, (fan_in, fan_out), jnp.float32, minval=-bound, maxval=bound
        )
        params[f"b{i}"] = jax.random.uniform(
            kb, (1, fan_out), jnp.float32, minval=-bound, maxval=bound
        )
    return params


def net_reference(x, params):
    h1 = jnp.maximum(x @ params["w1"] + params["b1"], 0.0)
    h2 = jnp.maximum(h1 @ params["w2"] + params["b2"], 0.0)
    return h2 @ params["w3"] + params["b3"]


if __name__ == "__main__":
    input_dim, output_dim = 16, 4

    key = jax.random.PRNGKey(0)
    key, kx = jax.random.split(key)
    params = init_params(key, input_dim, output_dim)

    # 1) small batch: single grid step, block == full array (Pallas path)
    x = jax.random.normal(kx, (8, input_dim), jnp.float32)
    out = jax.block_until_ready(net_forward(x, params))
    ref = net_reference(x, params)
    np.testing.assert_allclose(np.asarray(out), np.asarray(ref), rtol=1e-5, atol=1e-5)

    # 2) multi-tile: batch padding + >=2 "parallel" tiles (megacore path on v7x),
    #    128-aligned batch tiles, lane-dense transposed output stores.
    key, kx2 = jax.random.split(key)
    x2 = jax.random.normal(kx2, (600, input_dim), jnp.float32)
    out2 = jax.block_until_ready(net_forward(x2, params, tb=256))
    ref2 = net_reference(x2, params)
    np.testing.assert_allclose(np.asarray(out2), np.asarray(ref2), rtol=1e-5, atol=1e-5)

    # 3) small-batch fast path (pure XLA, no kernel launch)
    key, kx3 = jax.random.split(key)
    x3 = jax.random.normal(kx3, (20, input_dim), jnp.float32)
    out3 = jax.block_until_ready(net_forward(x3, params, min_pallas_batch=512))
    ref3 = net_reference(x3, params)
    np.testing.assert_allclose(np.asarray(out3), np.asarray(ref3), rtol=1e-5, atol=1e-5)

    print("KERNEL_OK")
</pallas_src>

<mosaic_0001>
module attributes {stable_mosaic.version = 11 : i64} {
  func.func @mlp_kernel(%arg0: i32, %arg1: memref<8x16xf32, #tpu.memory_space<vmem>>, %arg2: memref<16x64xf32, #tpu.memory_space<vmem>>, %arg3: memref<1x64xf32, #tpu.memory_space<vmem>>, %arg4: memref<64x32xf32, #tpu.memory_space<vmem>>, %arg5: memref<1x32xf32, #tpu.memory_space<vmem>>, %arg6: memref<8x32xf32, #tpu.memory_space<vmem>>, %arg7: memref<8x1xf32, #tpu.memory_space<vmem>>, %arg8: memref<8x8xf32, #tpu.memory_space<vmem>>) attributes {dimension_semantics = [#tpu.dimension_semantics<parallel>], iteration_bounds = array<i64: 1>, scalar_prefetch = 0 : i64, scratch_operands = 0 : i64, tpu.core_type = #tpu.core_type<tc>, window_params = [{transform_indices = @transform_0, window_bounds = array<i64: 8, 16>}, {pipeline_mode = #tpu.pipeline_mode<synchronous>, transform_indices = @transform_1, window_bounds = array<i64: 16, 64>}, {pipeline_mode = #tpu.pipeline_mode<synchronous>, transform_indices = @transform_2, window_bounds = array<i64: 1, 64>}, {pipeline_mode = #tpu.pipeline_mode<synchronous>, transform_indices = @transform_3, window_bounds = array<i64: 64, 32>}, {pipeline_mode = #tpu.pipeline_mode<synchronous>, transform_indices = @transform_4, window_bounds = array<i64: 1, 32>}, {pipeline_mode = #tpu.pipeline_mode<synchronous>, transform_indices = @transform_5, window_bounds = array<i64: 8, 32>}, {pipeline_mode = #tpu.pipeline_mode<synchronous>, transform_indices = @transform_6, window_bounds = array<i64: 8, 1>}, {transform_indices = @transform_7, window_bounds = array<i64: 8, 8>}]} {
    %c0 = arith.constant 0 : index
    %c0_0 = arith.constant 0 : index
    %0 = vector.load %arg1[%c0, %c0_0] : memref<8x16xf32, #tpu.memory_space<vmem>>, vector<8x16xf32>
    %c0_1 = arith.constant 0 : index
    %c0_2 = arith.constant 0 : index
    %1 = vector.load %arg2[%c0_1, %c0_2] : memref<16x64xf32, #tpu.memory_space<vmem>>, vector<16x64xf32>
    %cst = arith.constant dense<0.000000e+00> : vector<8x64xf32>
    %2 = tpu.matmul %0, %1, %cst {dimension_numbers = #tpu.dot_dimension_numbers<[1], [0], [0], [1], [0, 0, 1, 1], [], []>} : vector<8x16xf32>, vector<16x64xf32>, vector<8x64xf32> -> vector<8x64xf32>
    %c0_3 = arith.constant 0 : index
    %c0_4 = arith.constant 0 : index
    %3 = vector.load %arg3[%c0_3, %c0_4] : memref<1x64xf32, #tpu.memory_space<vmem>>, vector<1x64xf32>
    %4 = vector.broadcast %3 : vector<1x64xf32> to vector<8x64xf32>
    %5 = arith.addf %2, %4 : vector<8x64xf32>
    %cst_5 = arith.constant 0.000000e+00 : f32
    %6 = vector.broadcast %cst_5 : f32 to vector<8x64xf32>
    %7 = arith.maximumf %5, %6 : vector<8x64xf32>
    %c0_6 = arith.constant 0 : index
    %c0_7 = arith.constant 0 : index
    %8 = vector.load %arg4[%c0_6, %c0_7] : memref<64x32xf32, #tpu.memory_space<vmem>>, vector<64x32xf32>
    %cst_8 = arith.constant dense<0.000000e+00> : vector<8x32xf32>
    %9 = tpu.matmul %7, %8, %cst_8 {dimension_numbers = #tpu.dot_dimension_numbers<[1], [0], [0], [1], [0, 0, 1, 1], [], []>} : vector<8x64xf32>, vector<64x32xf32>, vector<8x32xf32> -> vector<8x32xf32>
    %c0_9 = arith.constant 0 : index
    %c0_10 = arith.constant 0 : index
    %10 = vector.load %arg5[%c0_9, %c0_10] : memref<1x32xf32, #tpu.memory_space<vmem>>, vector<1x32xf32>
    %11 = vector.broadcast %10 : vector<1x32xf32> to vector<8x32xf32>
    %12 = arith.addf %9, %11 : vector<8x32xf32>
    %cst_11 = arith.constant 0.000000e+00 : f32
    %13 = vector.broadcast %cst_11 : f32 to vector<8x32xf32>
    %14 = arith.maximumf %12, %13 : vector<8x32xf32>
    %c0_12 = arith.constant 0 : index
    %c0_13 = arith.constant 0 : index
    %15 = vector.load %arg6[%c0_12, %c0_13] : memref<8x32xf32, #tpu.memory_space<vmem>>, vector<8x32xf32>
    "tpu.trace_start"() <{level = 10 : i32, message = "ok,bk->ob"}> : () -> ()
    %cst_14 = arith.constant dense<0.000000e+00> : vector<8x8xf32>
    %16 = tpu.matmul %15, %14, %cst_14 {dimension_numbers = #tpu.dot_dimension_numbers<[1], [1], [0], [0], [0, 0, 1, 0], [], []>} : vector<8x32xf32>, vector<8x32xf32>, vector<8x8xf32> -> vector<8x8xf32>
    "tpu.trace_stop"() : () -> ()
    %c0_15 = arith.constant 0 : index
    %c0_16 = arith.constant 0 : index
    %17 = vector.load %arg7[%c0_15, %c0_16] : memref<8x1xf32, #tpu.memory_space<vmem>>, vector<8x1xf32>
    %18 = vector.broadcast %17 : vector<8x1xf32> to vector<8x8xf32>
    %19 = arith.addf %16, %18 : vector<8x8xf32>
    %c0_17 = arith.constant 0 : index
    %c0_18 = arith.constant 0 : index
    %20 = vector.load %arg8[%c0_17, %c0_18] : memref<8x8xf32, #tpu.memory_space<vmem>>, vector<8x8xf32>
    tpu.vector_store %arg8[%c0_17, %c0_18], %19 {strides = array<i32>} : memref<8x8xf32, #tpu.memory_space<vmem>>, vector<8x8xf32>,
    return
  }
  func.func @transform_0(%arg0: i32) -> (i32, i32) {
    %c0_i32 = arith.constant 0 : i32
    %c0_i32_0 = arith.constant 0 : i32
    return %arg0, %c0_i32 : i32, i32
  }
  func.func @transform_1(%arg0: i32) -> (i32, i32) {
    %c0_i32 = arith.constant 0 : i32
    %c0_i32_0 = arith.constant 0 : i32
    %c0_i32_1 = arith.constant 0 : i32
    return %c0_i32, %c0_i32_0 : i32, i32
  }
  func.func @transform_2(%arg0: i32) -> (i32, i32) {
    %c0_i32 = arith.constant 0 : i32
    %c0_i32_0 = arith.constant 0 : i32
    %c0_i32_1 = arith.constant 0 : i32
    return %c0_i32, %c0_i32_0 : i32, i32
  }
  func.func @transform_3(%arg0: i32) -> (i32, i32) {
    %c0_i32 = arith.constant 0 : i32
    %c0_i32_0 = arith.constant 0 : i32
    %c0_i32_1 = arith.constant 0 : i32
    return %c0_i32, %c0_i32_0 : i32, i32
  }
  func.func @transform_4(%arg0: i32) -> (i32, i32) {
    %c0_i32 = arith.constant 0 : i32
    %c0_i32_0 = arith.constant 0 : i32
    %c0_i32_1 = arith.constant 0 : i32
    return %c0_i32, %c0_i32_0 : i32, i32
  }
  func.func @transform_5(%arg0: i32) -> (i32, i32) {
    %c0_i32 = arith.constant 0 : i32
    %c0_i32_0 = arith.constant 0 : i32
    %c0_i32_1 = arith.constant 0 : i32
    return %c0_i32, %c0_i32_0 : i32, i32
  }
  func.func @transform_6(%arg0: i32) -> (i32, i32) {
    %c0_i32 = arith.constant 0 : i32
    %c0_i32_0 = arith.constant 0 : i32
    %c0_i32_1 = arith.constant 0 : i32
    return %c0_i32, %c0_i32_0 : i32, i32
  }
  func.func @transform_7(%arg0: i32) -> (i32, i32) {
    %c0_i32 = arith.constant 0 : i32
    %c0_i32_0 = arith.constant 0 : i32
    return %c0_i32, %arg0 : i32, i32
  }
}

</mosaic_0001>

<bundles_post_ra>
// kernel: tpu_custom_call.1
= control target key start
LH: loop header
LB: loop body
LE: loop exit
PB: predicated region body
PF: predicated region fallthrough
CT: control target
= control target key end

     0   :  { %vm34_vm0 = vcmask 130048   ;;  %s273_s0 = inlined_call_operand.vmem [shape: f32[8,16], index: 0, kind: input, shape index: {}]   ;;  %s274_s1 = inlined_call_operand.vmem [shape: f32[16,64], index: 1, kind: input, shape index: {}]   ;;  %s275_s2 = inlined_call_operand.vmem [shape: f32[1,64], index: 2, kind: input, shape index: {}]   ;;  %s276_s3 = inlined_call_operand.vmem [shape: f32[64,32], index: 3, kind: input, shape index: {}]   ;;  %s277_s4 = inlined_call_operand.vmem [shape: f32[1,32], index: 4, kind: input, shape index: {}]   ;;  %s278_s5 = inlined_call_operand.vmem [shape: f32[8,32], index: 5, kind: input, shape index: {}]   ;;  %s279_s6 = inlined_call_operand.vmem [shape: f32[8,1], index: 6, kind: input, shape index: {}]   ;;  %s280_s7 = inlined_call_operand.hbm [shape: f32[8,8], index: 7, kind: output, shape index: {}]  }
   0x1   :  { %v29_v0 = vld [vmem:[%s274_s1 + $0x8] sm:$0xff]  ;;  %v28_v1 = vld [vmem:[%s274_s1] sm:$0xff]  ;;  %v66_v3 = vld [vmem:[%s276_s3 + $0x38] sm:$0xff] }
   0x2   :  { %52 = vmatpush.msra.mxu0 %v29_v0  ;;  %v27_v2 = vld [vmem:[%s273_s0] sm:$0xff]  ;;  %v65_v4 = vld [vmem:[%s276_s3 + $0x30] sm:$0xff]  ;;  %83 = vmatpush.msra.mxu1 %v66_v3  ;;  %v64_v5 = vld [vmem:[%s276_s3 + $0x28] sm:$0xff] }
   0x4   :  { %53 = vmatpush.msra.mxu0 %v28_v1 }
   0x5   :  { %12 = vsyncpa [#allocation3], 0  ;;  %148 = vmatmul.msk.f32.vlgmr.msra.gmra.mxu0 %vm34_vm0, %v27_v2  ;;  %84 = vmatpush.msra.mxu1 %v65_v4  ;;  %v63_v6 = vld [vmem:[%s276_s3 + $0x20] sm:$0xff]  ;;  %v62_v7 = vld [vmem:[%s276_s3 + $0x18] sm:$0xff]  ;;  %vm71_vm1 = vcmask 523264   ;;  %v183_v16 = vmov 0  }
   0x6   :  { %v61_v8 = vld [vmem:[%s276_s3 + $0x10] sm:$0xff]  ;;  %v60_v9 = vld [vmem:[%s276_s3 + $0x8] sm:$0xff]  ;;  %v59_v10 = vld [vmem:[%s276_s3] sm:$0xff]  ;;  %154 = vset.pattern.permute.xlu0 %v183_v16  ;;  %vm103_vm2 = vcmask 261120   ;;  %s184_s27 = smov [#allocation2]   ;;  %s139_s30 = sshll.u32 %s280_s7, 4  ;;  %s140_s30 = int_to_ptr.hbm [resolvable:$true] %s139_s30 }
   0x7   :  { %85 = vmatpush.msra.mxu1 %v64_v5  ;;  %v155_v11 = vld [vmem:[%s275_s2] ss:$0 sm:$0xff]  ;;  %vm130_vm3 = vcmask 64512  }
   0x8   :  { %v97_v15 = vld [vmem:[%s279_s6] sm:$0xff]  ;;  %s137_s6 = sshll.u32 %s184_s27, 4  ;;  %s138_s6 = int_to_ptr.vmem [resolvable:$true] %s137_s6 }
   0x9   :  { %86 = vmatpush.msra.mxu1 %v63_v6  ;;  %100 = vperm.xlu0 %154, %v97_v15   ;;  %v156_v17 = vld [vmem:[%s277_s4] ss:$0 sm:$0xff] }
   0xa   :  { %v96_v21 = vld [vmem:[%s278_s5] sm:$0xff] }
   0xb   :  { %87 = vmatpush.msra.mxu1 %v62_v7 }
   0xd   :  { %88 = vmatpush.msra.mxu1 %v61_v8 }
   0xf   :  { %89 = vmatpush.msra.mxu1 %v60_v9 }
  0x11   :  { %90 = vmatpush.msra.mxu1 %v59_v10 }
  0x7b   :  { %v101_v22 = vpop.permute.xlu0 %100 }
  0x82   :  { %v55_v12 = vpop.f32.mrf.mxu0 }
  0x83   :  { %v56_v13 = vadd.f32 %v155_v11, %v55_v12 }
  0x85   :  { %v58_v14 = vmax.f32 %v56_v13, 0.0 }
  0x87   :  { %149 = vmatmul.msk.f32.vlgmr.msra.gmra.mxu1 %vm71_vm1, %v58_v14 }
 0x104   :  { %v92_v18 = vpop.f32.mrf.mxu1 }
 0x105   :  { %v93_v19 = vadd.f32 %v156_v17, %v92_v18 }
 0x107   :  { %v95_v20 = vmax.f32 %v93_v19, 0.0 }
 0x109   :  { %150 = vmatpush.xpose.msk.msra.mxu2 %vm103_vm2, %v95_v20 }
 0x10c   :  { %151 = vmatmul.msk.f32.vlgmr.msra.gmra.mxu2 %vm103_vm2, %v96_v21 }
 0x18f   :  { %v127_v23 = vpop.f32.mrf.mxu2 }
 0x190   :  { %v128_v24 = vadd.f32 %v127_v23, %v101_v22 }
 0x192   :  { %131 = vst.msk [vmem:[#allocation2] sm:$0xff] %vm130_vm3, %v128_v24 }
 0x193   :  { %142 = dma.vmem_to_hbm [thread:$0]  %s138_s6, 128, %s140_s30, [#allocation3]  }
 0x194   :  { %181 = dma.done.wait [#allocation3], 128  }
 0x195   :  { %182 = vsyncadd [#allocation3], 4294967168 }
 0x196   :  { %147 = vsyncpa [#allocation3], 1 }

</bundles_post_ra>
